<compile_context>
chip_gen: v5e
topology: v5e:2x2
jax: 0.10.0
libtpu: 0.0.40
codegen_flags: <defaults>
</compile_context>

<pallas_src>
import jax
import jax.numpy as jnp
from jax.experimental import pallas as pl
from jax.experimental.pallas import tpu as pltpu


def _make_kernel(num_bands: int, num_offsets: int, num_layers: int,
                 pooling: str, in_features: int, h_last: int):
    """Row-tile kernel: loops over bands and offsets, MLP + online pooling."""

    inv_k = 1.0 / float(num_offsets)

    def kernel(x_ref, w0_ref, b0_ref, *rest):
        out_ref = rest[-1]
        deep_refs = rest[:-1]  # (w1, b1, w2, b2, ...) for layers 1..L-1

        for b in range(num_bands):
            # Static lane slice of this band's flattened features: (TM, F).
            xb = x_ref[:, b * in_features:(b + 1) * in_features]
            if xb.dtype != w0_ref.dtype:
                xb = xb.astype(w0_ref.dtype)

            acc = None
            for k in range(num_offsets):
                # First layer with the per-offset pre-rolled weights (MXU),
                # f32 accumulation, bias + ReLU on the VPU.
                h = jnp.dot(xb, w0_ref[b, k],
                            preferred_element_type=jnp.float32)
                h = jnp.maximum(h + b0_ref[b], 0.0)

                for layer in range(1, num_layers):
                    w = deep_refs[2 * (layer - 1)][b]        # (F_l, H_l)
                    bias = deep_refs[2 * (layer - 1) + 1][b]  # (1, H_l)
                    hl = h if h.dtype == w.dtype else h.astype(w.dtype)
                    h = jnp.dot(hl, w, preferred_element_type=jnp.float32)
                    h = jnp.maximum(h + bias, 0.0)

                # Online pooling over offsets: keeps only (TM, H_last) live.
                if acc is None:
                    acc = h
                elif pooling == "max":
                    acc = jnp.maximum(acc, h)
                else:
                    acc = acc + h

            if pooling == "mean" and num_offsets > 1:
                acc = acc * inv_k

            out_ref[:, b * h_last:(b + 1) * h_last] = acc.astype(out_ref.dtype)

    return kernel


def multiband_rotation_invariant_mlp(x, weights, biases, *,
                                     offsets=(-1, 0, 1),
                                     pooling="mean",
                                     stack_dim=2,
                                     row_tile=512):
    """x: (T, N, num_bands, C, ...); weights[l]: (num_bands, F_l, H_l);
    biases[l]: (num_bands, 1, H_l).  Returns (T, N, num_bands, H_last)."""
    assert stack_dim == 2
    assert pooling in ("mean", "max")
    offs = tuple(offsets) if len(offsets) > 0 else (0,)
    K = len(offs)

    T, N, num_bands, C = x.shape[0], x.shape[1], x.shape[2], x.shape[3]
    trailing = 1
    for d in x.shape[4:]:
        trailing *= d
    in_features = C * trailing
    M = T * N

    num_layers = len(weights)
    h_last = weights[-1].shape[-1]

    # (T, N, B, C, ...) -> (M, B*F): a pure reshape (no transpose, no copy).
    x_kernel = x.reshape(M, num_bands * in_features)

    # Fold the per-offset channel roll into the first-layer weights:
    #   roll(x, o, channel_axis) @ W0 == x @ roll(W0, -o*trailing, feature_axis)
    # (flattened features are channel-major, so channel roll == feature roll
    #  by o*trailing).  Tiny, done once at trace time.
    w0 = weights[0]                                    # (B, F, H1)
    w0_rolled = jnp.stack(
        [jnp.roll(w0, -o * trailing, axis=1) for o in offs], axis=1)  # (B,K,F,H1)

    # Row tiling: TM rows per grid step (multiple of 8, or the full M).
    tm = M if M <= row_tile else row_tile
    grid = (pl.cdiv(M, tm),)

    in_specs = [
        pl.BlockSpec((tm, num_bands * in_features), lambda m: (m, 0)),
        # Weights/biases: full blocks with constant index_maps -> DMA'd once,
        # resident in VMEM across all row tiles.
        pl.BlockSpec(w0_rolled.shape, lambda m: (0, 0, 0, 0)),
        pl.BlockSpec(biases[0].shape, lambda m: (0, 0, 0)),
    ]
    args = [x_kernel, w0_rolled, biases[0]]
    for layer in range(1, num_layers):
        in_specs.append(pl.BlockSpec(weights[layer].shape, lambda m: (0, 0, 0)))
        in_specs.append(pl.BlockSpec(biases[layer].shape, lambda m: (0, 0, 0)))
        args.append(weights[layer])
        args.append(biases[layer])

    out = pl.pallas_call(
        _make_kernel(num_bands, K, num_layers, pooling, in_features, h_last),
        out_shape=jax.ShapeDtypeStruct((M, num_bands * h_last), jnp.float32),
        grid=grid,
        in_specs=in_specs,
        out_specs=pl.BlockSpec((tm, num_bands * h_last), lambda m: (m, 0)),
        compiler_params=pltpu.CompilerParams(
            dimension_semantics=("parallel",)),
    )(*args)

    # (M, B*H) -> (T, N, B, H): pure reshape, no data movement.
    return out.reshape(T, N, num_bands, h_last)


def _reference(x, weights, biases, offsets, pooling):
    """Pure-JAX reference mirroring the PyTorch module."""
    T, N, B = x.shape[0], x.shape[1], x.shape[2]
    offs = tuple(offsets) if len(offsets) > 0 else (0,)
    outs = []
    for b in range(B):
        xb = x[:, :, b]                                           # (T, N, C, ...)
        stacked = jnp.stack([jnp.roll(xb, o, axis=2) for o in offs], axis=2)
        h = stacked.reshape(T, N, len(offs), -1).astype(jnp.float32)
        for layer in range(len(weights)):
            h = jnp.maximum(h @ weights[layer][b] + biases[layer][b][0], 0.0)
        outs.append(h.max(axis=2) if pooling == "max" else h.mean(axis=2))
    return jnp.stack(outs, axis=2)


if __name__ == "__main__":
    # Small shapes consistent with the module:
    #   T=8, N=2, num_bands=2, electrode_channels C=8, trailing dim W=2
    #   -> in_features = C * W = 16, mlp_features = (32, 16)
    T, N, num_bands, C, W = 8, 2, 2, 8, 2
    in_features = C * W
    mlp_features = (32, 16)
    offsets = (-1, 0, 1)
    pooling = "mean"

    key = jax.random.PRNGKey(0)
    kx, *kparams = jax.random.split(key, 1 + 2 * len(mlp_features))

    x = jax.random.normal(kx, (T, N, num_bands, C, W), dtype=jnp.float32)

    # Deterministic per-band parameters (one Linear per mlp_features entry).
    weights, biases = [], []
    fan_in = in_features
    for i, h in enumerate(mlp_features):
        kw, kb = jax.random.split(kparams[i])
        scale = 1.0 / jnp.sqrt(jnp.float32(fan_in))
        weights.append(
            jax.random.uniform(kw, (num_bands, fan_in, h), jnp.float32,
                               -scale, scale))
        biases.append(
            jax.random.uniform(kb, (num_bands, 1, h), jnp.float32,
                               -scale, scale))
        fan_in = h

    out = multiband_rotation_invariant_mlp(
        x, weights, biases, offsets=offsets, pooling=pooling)
    out = jax.block_until_ready(out)

    ref = _reference(x, weights, biases, offsets, pooling)
    assert out.shape == (T, N, num_bands, mlp_features[-1]), out.shape
    assert jnp.allclose(out, ref, atol=2e-5, rtol=1e-4), \
        float(jnp.max(jnp.abs(out - ref)))

    print("KERNEL_OK")
</pallas_src>

<mosaic_0001>
module attributes {stable_mosaic.version = 11 : i64} {
  func.func @kernel(%arg0: i32, %arg1: memref<16x32xf32, #tpu.memory_space<vmem>>, %arg2: memref<2x3x16x32xf32, #tpu.memory_space<vmem>>, %arg3: memref<2x1x32xf32, #tpu.memory_space<vmem>>, %arg4: memref<2x32x16xf32, #tpu.memory_space<vmem>>, %arg5: memref<2x1x16xf32, #tpu.memory_space<vmem>>, %arg6: memref<16x32xf32, #tpu.memory_space<vmem>>) attributes {dimension_semantics = [#tpu.dimension_semantics<parallel>], iteration_bounds = array<i64: 1>, scalar_prefetch = 0 : i64, scratch_operands = 0 : i64, tpu.core_type = #tpu.core_type<tc>, window_params = [{transform_indices = @transform_0, window_bounds = array<i64: 16, 32>}, {pipeline_mode = #tpu.pipeline_mode<synchronous>, transform_indices = @transform_1, window_bounds = array<i64: 2, 3, 16, 32>}, {pipeline_mode = #tpu.pipeline_mode<synchronous>, transform_indices = @transform_2, window_bounds = array<i64: 2, 1, 32>}, {pipeline_mode = #tpu.pipeline_mode<synchronous>, transform_indices = @transform_3, window_bounds = array<i64: 2, 32, 16>}, {pipeline_mode = #tpu.pipeline_mode<synchronous>, transform_indices = @transform_4, window_bounds = array<i64: 2, 1, 16>}, {transform_indices = @transform_5, window_bounds = array<i64: 16, 32>}]} {
    %c0 = arith.constant 0 : index
    %c0_0 = arith.constant 0 : index
    %0 = vector.load %arg1[%c0, %c0_0] : memref<16x32xf32, #tpu.memory_space<vmem>>, vector<16x16xf32>
    %c0_1 = arith.constant 0 : index
    %c0_2 = arith.constant 0 : index
    %c0_3 = arith.constant 0 : index
    %c0_4 = arith.constant 0 : index
    %1 = vector.load %arg2[%c0_1, %c0_2, %c0_3, %c0_4] : memref<2x3x16x32xf32, #tpu.memory_space<vmem>>, vector<1x1x16x32xf32>
    %2 = vector.shape_cast %1 : vector<1x1x16x32xf32> to vector<16x32xf32>
    %cst = arith.constant dense<0.000000e+00> : vector<16x32xf32>
    %3 = tpu.matmul %0, %2, %cst {dimension_numbers = #tpu.dot_dimension_numbers<[1], [0], [0], [1], [0, 0, 1, 1], [], []>} : vector<16x16xf32>, vector<16x32xf32>, vector<16x32xf32> -> vector<16x32xf32>
    %c0_5 = arith.constant 0 : index
    %c0_6 = arith.constant 0 : index
    %c0_7 = arith.constant 0 : index
    %4 = vector.load %arg3[%c0_5, %c0_6, %c0_7] : memref<2x1x32xf32, #tpu.memory_space<vmem>>, vector<1x1x32xf32>
    %5 = vector.shape_cast %4 : vector<1x1x32xf32> to vector<1x32xf32>
    %6 = vector.broadcast %5 : vector<1x32xf32> to vector<16x32xf32>
    %7 = arith.addf %3, %6 : vector<16x32xf32>
    %cst_8 = arith.constant 0.000000e+00 : f32
    %8 = vector.broadcast %cst_8 : f32 to vector<16x32xf32>
    %9 = arith.maximumf %7, %8 : vector<16x32xf32>
    %c0_9 = arith.constant 0 : index
    %c0_10 = arith.constant 0 : index
    %c0_11 = arith.constant 0 : index
    %10 = vector.load %arg4[%c0_9, %c0_10, %c0_11] : memref<2x32x16xf32, #tpu.memory_space<vmem>>, vector<1x32x16xf32>
    %11 = vector.shape_cast %10 : vector<1x32x16xf32> to vector<32x16xf32>
    %c0_12 = arith.constant 0 : index
    %c0_13 = arith.constant 0 : index
    %c0_14 = arith.constant 0 : index
    %12 = vector.load %arg5[%c0_12, %c0_13, %c0_14] : memref<2x1x16xf32, #tpu.memory_space<vmem>>, vector<1x1x16xf32>
    %13 = vector.shape_cast %12 : vector<1x1x16xf32> to vector<1x16xf32>
    %cst_15 = arith.constant dense<0.000000e+00> : vector<16x16xf32>
    %14 = tpu.matmul %9, %11, %cst_15 {dimension_numbers = #tpu.dot_dimension_numbers<[1], [0], [0], [1], [0, 0, 1, 1], [], []>} : vector<16x32xf32>, vector<32x16xf32>, vector<16x16xf32> -> vector<16x16xf32>
    %15 = vector.broadcast %13 : vector<1x16xf32> to vector<16x16xf32>
    %16 = arith.addf %14, %15 : vector<16x16xf32>
    %cst_16 = arith.constant 0.000000e+00 : f32
    %17 = vector.broadcast %cst_16 : f32 to vector<16x16xf32>
    %18 = arith.maximumf %16, %17 : vector<16x16xf32>
    %c0_17 = arith.constant 0 : index
    %c1 = arith.constant 1 : index
    %c0_18 = arith.constant 0 : index
    %c0_19 = arith.constant 0 : index
    %19 = vector.load %arg2[%c0_17, %c1, %c0_18, %c0_19] : memref<2x3x16x32xf32, #tpu.memory_space<vmem>>, vector<1x1x16x32xf32>
    %20 = vector.shape_cast %19 : vector<1x1x16x32xf32> to vector<16x32xf32>
    %cst_20 = arith.constant dense<0.000000e+00> : vector<16x32xf32>
    %21 = tpu.matmul %0, %20, %cst_20 {dimension_numbers = #tpu.dot_dimension_numbers<[1], [0], [0], [1], [0, 0, 1, 1], [], []>} : vector<16x16xf32>, vector<16x32xf32>, vector<16x32xf32> -> vector<16x32xf32>
    %c0_21 = arith.constant 0 : index
    %c0_22 = arith.constant 0 : index
    %c0_23 = arith.constant 0 : index
    %22 = vector.load %arg3[%c0_21, %c0_22, %c0_23] : memref<2x1x32xf32, #tpu.memory_space<vmem>>, vector<1x1x32xf32>
    %23 = vector.shape_cast %22 : vector<1x1x32xf32> to vector<1x32xf32>
    %24 = vector.broadcast %23 : vector<1x32xf32> to vector<16x32xf32>
    %25 = arith.addf %21, %24 : vector<16x32xf32>
    %cst_24 = arith.constant 0.000000e+00 : f32
    %26 = vector.broadcast %cst_24 : f32 to vector<16x32xf32>
    %27 = arith.maximumf %25, %26 : vector<16x32xf32>
    %c0_25 = arith.constant 0 : index
    %c0_26 = arith.constant 0 : index
    %c0_27 = arith.constant 0 : index
    %28 = vector.load %arg4[%c0_25, %c0_26, %c0_27] : memref<2x32x16xf32, #tpu.memory_space<vmem>>, vector<1x32x16xf32>
    %29 = vector.shape_cast %28 : vector<1x32x16xf32> to vector<32x16xf32>
    %c0_28 = arith.constant 0 : index
    %c0_29 = arith.constant 0 : index
    %c0_30 = arith.constant 0 : index
    %30 = vector.load %arg5[%c0_28, %c0_29, %c0_30] : memref<2x1x16xf32, #tpu.memory_space<vmem>>, vector<1x1x16xf32>
    %31 = vector.shape_cast %30 : vector<1x1x16xf32> to vector<1x16xf32>
    %cst_31 = arith.constant dense<0.000000e+00> : vector<16x16xf32>
    %32 = tpu.matmul %27, %29, %cst_31 {dimension_numbers = #tpu.dot_dimension_numbers<[1], [0], [0], [1], [0, 0, 1, 1], [], []>} : vector<16x32xf32>, vector<32x16xf32>, vector<16x16xf32> -> vector<16x16xf32>
    %33 = vector.broadcast %31 : vector<1x16xf32> to vector<16x16xf32>
    %34 = arith.addf %32, %33 : vector<16x16xf32>
    %cst_32 = arith.constant 0.000000e+00 : f32
    %35 = vector.broadcast %cst_32 : f32 to vector<16x16xf32>
    %36 = arith.maximumf %34, %35 : vector<16x16xf32>
    %37 = arith.addf %18, %36 : vector<16x16xf32>
    %c0_33 = arith.constant 0 : index
    %c2 = arith.constant 2 : index
    %c0_34 = arith.constant 0 : index
    %c0_35 = arith.constant 0 : index
    %38 = vector.load %arg2[%c0_33, %c2, %c0_34, %c0_35] : memref<2x3x16x32xf32, #tpu.memory_space<vmem>>, vector<1x1x16x32xf32>
    %39 = vector.shape_cast %38 : vector<1x1x16x32xf32> to vector<16x32xf32>
    %cst_36 = arith.constant dense<0.000000e+00> : vector<16x32xf32>
    %40 = tpu.matmul %0, %39, %cst_36 {dimension_numbers = #tpu.dot_dimension_numbers<[1], [0], [0], [1], [0, 0, 1, 1], [], []>} : vector<16x16xf32>, vector<16x32xf32>, vector<16x32xf32> -> vector<16x32xf32>
    %c0_37 = arith.constant 0 : index
    %c0_38 = arith.constant 0 : index
    %c0_39 = arith.constant 0 : index
    %41 = vector.load %arg3[%c0_37, %c0_38, %c0_39] : memref<2x1x32xf32, #tpu.memory_space<vmem>>, vector<1x1x32xf32>
    %42 = vector.shape_cast %41 : vector<1x1x32xf32> to vector<1x32xf32>
    %43 = vector.broadcast %42 : vector<1x32xf32> to vector<16x32xf32>
    %44 = arith.addf %40, %43 : vector<16x32xf32>
    %cst_40 = arith.constant 0.000000e+00 : f32
    %45 = vector.broadcast %cst_40 : f32 to vector<16x32xf32>
    %46 = arith.maximumf %44, %45 : vector<16x32xf32>
    %c0_41 = arith.constant 0 : index
    %c0_42 = arith.constant 0 : index
    %c0_43 = arith.constant 0 : index
    %47 = vector.load %arg4[%c0_41, %c0_42, %c0_43] : memref<2x32x16xf32, #tpu.memory_space<vmem>>, vector<1x32x16xf32>
    %48 = vector.shape_cast %47 : vector<1x32x16xf32> to vector<32x16xf32>
    %c0_44 = arith.constant 0 : index
    %c0_45 = arith.constant 0 : index
    %c0_46 = arith.constant 0 : index
    %49 = vector.load %arg5[%c0_44, %c0_45, %c0_46] : memref<2x1x16xf32, #tpu.memory_space<vmem>>, vector<1x1x16xf32>
    %50 = vector.shape_cast %49 : vector<1x1x16xf32> to vector<1x16xf32>
    %cst_47 = arith.constant dense<0.000000e+00> : vector<16x16xf32>
    %51 = tpu.matmul %46, %48, %cst_47 {dimension_numbers = #tpu.dot_dimension_numbers<[1], [0], [0], [1], [0, 0, 1, 1], [], []>} : vector<16x32xf32>, vector<32x16xf32>, vector<16x16xf32> -> vector<16x16xf32>
    %52 = vector.broadcast %50 : vector<1x16xf32> to vector<16x16xf32>
    %53 = arith.addf %51, %52 : vector<16x16xf32>
    %cst_48 = arith.constant 0.000000e+00 : f32
    %54 = vector.broadcast %cst_48 : f32 to vector<16x16xf32>
    %55 = arith.maximumf %53, %54 : vector<16x16xf32>
    %56 = arith.addf %37, %55 : vector<16x16xf32>
    %cst_49 = arith.constant 0.333333343 : f32
    %57 = vector.broadcast %cst_49 : f32 to vector<16x16xf32>
    %58 = arith.mulf %56, %57 : vector<16x16xf32>
    %c0_50 = arith.constant 0 : index
    %c0_51 = arith.constant 0 : index
    %59 = vector.load %arg6[%c0_50, %c0_51] : memref<16x32xf32, #tpu.memory_space<vmem>>, vector<16x16xf32>
    tpu.vector_store %arg6[%c0_50, %c0_51], %58 {strides = array<i32>} : memref<16x32xf32, #tpu.memory_space<vmem>>, vector<16x16xf32>,
    %c0_52 = arith.constant 0 : index
    %c16 = arith.constant 16 : index
    %60 = vector.load %arg1[%c0_52, %c16] : memref<16x32xf32, #tpu.memory_space<vmem>>, vector<16x16xf32>
    %c1_53 = arith.constant 1 : index
    %c0_54 = arith.constant 0 : index
    %c0_55 = arith.constant 0 : index
    %c0_56 = arith.constant 0 : index
    %61 = vector.load %arg2[%c1_53, %c0_54, %c0_55, %c0_56] : memref<2x3x16x32xf32, #tpu.memory_space<vmem>>, vector<1x1x16x32xf32>
    %62 = vector.shape_cast %61 : vector<1x1x16x32xf32> to vector<16x32xf32>
    %cst_57 = arith.constant dense<0.000000e+00> : vector<16x32xf32>
    %63 = tpu.matmul %60, %62, %cst_57 {dimension_numbers = #tpu.dot_dimension_numbers<[1], [0], [0], [1], [0, 0, 1, 1], [], []>} : vector<16x16xf32>, vector<16x32xf32>, vector<16x32xf32> -> vector<16x32xf32>
    %c1_58 = arith.constant 1 : index
    %c0_59 = arith.constant 0 : index
    %c0_60 = arith.constant 0 : index
    %64 = vector.load %arg3[%c1_58, %c0_59, %c0_60] : memref<2x1x32xf32, #tpu.memory_space<vmem>>, vector<1x1x32xf32>
    %65 = vector.shape_cast %64 : vector<1x1x32xf32> to vector<1x32xf32>
    %66 = vector.broadcast %65 : vector<1x32xf32> to vector<16x32xf32>
    %67 = arith.addf %63, %66 : vector<16x32xf32>
    %cst_61 = arith.constant 0.000000e+00 : f32
    %68 = vector.broadcast %cst_61 : f32 to vector<16x32xf32>
    %69 = arith.maximumf %67, %68 : vector<16x32xf32>
    %c1_62 = arith.constant 1 : index
    %c0_63 = arith.constant 0 : index
    %c0_64 = arith.constant 0 : index
    %70 = vector.load %arg4[%c1_62, %c0_63, %c0_64] : memref<2x32x16xf32, #tpu.memory_space<vmem>>, vector<1x32x16xf32>
    %71 = vector.shape_cast %70 : vector<1x32x16xf32> to vector<32x16xf32>
    %c1_65 = arith.constant 1 : index
    %c0_66 = arith.constant 0 : index
    %c0_67 = arith.constant 0 : index
    %72 = vector.load %arg5[%c1_65, %c0_66, %c0_67] : memref<2x1x16xf32, #tpu.memory_space<vmem>>, vector<1x1x16xf32>
    %73 = vector.shape_cast %72 : vector<1x1x16xf32> to vector<1x16xf32>
    %cst_68 = arith.constant dense<0.000000e+00> : vector<16x16xf32>
    %74 = tpu.matmul %69, %71, %cst_68 {dimension_numbers = #tpu.dot_dimension_numbers<[1], [0], [0], [1], [0, 0, 1, 1], [], []>} : vector<16x32xf32>, vector<32x16xf32>, vector<16x16xf32> -> vector<16x16xf32>
    %75 = vector.broadcast %73 : vector<1x16xf32> to vector<16x16xf32>
    %76 = arith.addf %74, %75 : vector<16x16xf32>
    %cst_69 = arith.constant 0.000000e+00 : f32
    %77 = vector.broadcast %cst_69 : f32 to vector<16x16xf32>
    %78 = arith.maximumf %76, %77 : vector<16x16xf32>
    %c1_70 = arith.constant 1 : index
    %c1_71 = arith.constant 1 : index
    %c0_72 = arith.constant 0 : index
    %c0_73 = arith.constant 0 : index
    %79 = vector.load %arg2[%c1_70, %c1_71, %c0_72, %c0_73] : memref<2x3x16x32xf32, #tpu.memory_space<vmem>>, vector<1x1x16x32xf32>
    %80 = vector.shape_cast %79 : vector<1x1x16x32xf32> to vector<16x32xf32>
    %cst_74 = arith.constant dense<0.000000e+00> : vector<16x32xf32>
    %81 = tpu.matmul %60, %80, %cst_74 {dimension_numbers = #tpu.dot_dimension_numbers<[1], [0], [0], [1], [0, 0, 1, 1], [], []>} : vector<16x16xf32>, vector<16x32xf32>, vector<16x32xf32> -> vector<16x32xf32>
    %c1_75 = arith.constant 1 : index
    %c0_76 = arith.constant 0 : index
    %c0_77 = arith.constant 0 : index
    %82 = vector.load %arg3[%c1_75, %c0_76, %c0_77] : memref<2x1x32xf32, #tpu.memory_space<vmem>>, vector<1x1x32xf32>
    %83 = vector.shape_cast %82 : vector<1x1x32xf32> to vector<1x32xf32>
    %84 = vector.broadcast %83 : vector<1x32xf32> to vector<16x32xf32>
    %85 = arith.addf %81, %84 : vector<16x32xf32>
    %cst_78 = arith.constant 0.000000e+00 : f32
    %86 = vector.broadcast %cst_78 : f32 to vector<16x32xf32>
    %87 = arith.maximumf %85, %86 : vector<16x32xf32>
    %c1_79 = arith.constant 1 : index
    %c0_80 = arith.constant 0 : index
    %c0_81 = arith.constant 0 : index
    %88 = vector.load %arg4[%c1_79, %c0_80, %c0_81] : memref<2x32x16xf32, #tpu.memory_space<vmem>>, vector<1x32x16xf32>
    %89 = vector.shape_cast %88 : vector<1x32x16xf32> to vector<32x16xf32>
    %c1_82 = arith.constant 1 : index
    %c0_83 = arith.constant 0 : index
    %c0_84 = arith.constant 0 : index
    %90 = vector.load %arg5[%c1_82, %c0_83, %c0_84] : memref<2x1x16xf32, #tpu.memory_space<vmem>>, vector<1x1x16xf32>
    %91 = vector.shape_cast %90 : vector<1x1x16xf32> to vector<1x16xf32>
    %cst_85 = arith.constant dense<0.000000e+00> : vector<16x16xf32>
    %92 = tpu.matmul %87, %89, %cst_85 {dimension_numbers = #tpu.dot_dimension_numbers<[1], [0], [0], [1], [0, 0, 1, 1], [], []>} : vector<16x32xf32>, vector<32x16xf32>, vector<16x16xf32> -> vector<16x16xf32>
    %93 = vector.broadcast %91 : vector<1x16xf32> to vector<16x16xf32>
    %94 = arith.addf %92, %93 : vector<16x16xf32>
    %cst_86 = arith.constant 0.000000e+00 : f32
    %95 = vector.broadcast %cst_86 : f32 to vector<16x16xf32>
    %96 = arith.maximumf %94, %95 : vector<16x16xf32>
    %97 = arith.addf %78, %96 : vector<16x16xf32>
    %c1_87 = arith.constant 1 : index
    %c2_88 = arith.constant 2 : index
    %c0_89 = arith.constant 0 : index
    %c0_90 = arith.constant 0 : index
    %98 = vector.load %arg2[%c1_87, %c2_88, %c0_89, %c0_90] : memref<2x3x16x32xf32, #tpu.memory_space<vmem>>, vector<1x1x16x32xf32>
    %99 = vector.shape_cast %98 : vector<1x1x16x32xf32> to vector<16x32xf32>
    %cst_91 = arith.constant dense<0.000000e+00> : vector<16x32xf32>
    %100 = tpu.matmul %60, %99, %cst_91 {dimension_numbers = #tpu.dot_dimension_numbers<[1], [0], [0], [1], [0, 0, 1, 1], [], []>} : vector<16x16xf32>, vector<16x32xf32>, vector<16x32xf32> -> vector<16x32xf32>
    %c1_92 = arith.constant 1 : index
    %c0_93 = arith.constant 0 : index
    %c0_94 = arith.constant 0 : index
    %101 = vector.load %arg3[%c1_92, %c0_93, %c0_94] : memref<2x1x32xf32, #tpu.memory_space<vmem>>, vector<1x1x32xf32>
    %102 = vector.shape_cast %101 : vector<1x1x32xf32> to vector<1x32xf32>
    %103 = vector.broadcast %102 : vector<1x32xf32> to vector<16x32xf32>
    %104 = arith.addf %100, %103 : vector<16x32xf32>
    %cst_95 = arith.constant 0.000000e+00 : f32
    %105 = vector.broadcast %cst_95 : f32 to vector<16x32xf32>
    %106 = arith.maximumf %104, %105 : vector<16x32xf32>
    %c1_96 = arith.constant 1 : index
    %c0_97 = arith.constant 0 : index
    %c0_98 = arith.constant 0 : index
    %107 = vector.load %arg4[%c1_96, %c0_97, %c0_98] : memref<2x32x16xf32, #tpu.memory_space<vmem>>, vector<1x32x16xf32>
    %108 = vector.shape_cast %107 : vector<1x32x16xf32> to vector<32x16xf32>
    %c1_99 = arith.constant 1 : index
    %c0_100 = arith.constant 0 : index
    %c0_101 = arith.constant 0 : index
    %109 = vector.load %arg5[%c1_99, %c0_100, %c0_101] : memref<2x1x16xf32, #tpu.memory_space<vmem>>, vector<1x1x16xf32>
    %110 = vector.shape_cast %109 : vector<1x1x16xf32> to vector<1x16xf32>
    %cst_102 = arith.constant dense<0.000000e+00> : vector<16x16xf32>
    %111 = tpu.matmul %106, %108, %cst_102 {dimension_numbers = #tpu.dot_dimension_numbers<[1], [0], [0], [1], [0, 0, 1, 1], [], []>} : vector<16x32xf32>, vector<32x16xf32>, vector<16x16xf32> -> vector<16x16xf32>
    %112 = vector.broadcast %110 : vector<1x16xf32> to vector<16x16xf32>
    %113 = arith.addf %111, %112 : vector<16x16xf32>
    %cst_103 = arith.constant 0.000000e+00 : f32
    %114 = vector.broadcast %cst_103 : f32 to vector<16x16xf32>
    %115 = arith.maximumf %113, %114 : vector<16x16xf32>
    %116 = arith.addf %97, %115 : vector<16x16xf32>
    %cst_104 = arith.constant 0.333333343 : f32
    %117 = vector.broadcast %cst_104 : f32 to vector<16x16xf32>
    %118 = arith.mulf %116, %117 : vector<16x16xf32>
    %c0_105 = arith.constant 0 : index
    %c16_106 = arith.constant 16 : index
    %119 = vector.load %arg6[%c0_105, %c16_106] : memref<16x32xf32, #tpu.memory_space<vmem>>, vector<16x16xf32>
    tpu.vector_store %arg6[%c0_105, %c16_106], %118 {strides = array<i32>} : memref<16x32xf32, #tpu.memory_space<vmem>>, vector<16x16xf32>,
    return
  }
  func.func @transform_0(%arg0: i32) -> (i32, i32) {
    %c0_i32 = arith.constant 0 : i32
    %c0_i32_0 = arith.constant 0 : i32
    return %arg0, %c0_i32 : i32, i32
  }
  func.func @transform_1(%arg0: i32) -> (i32, i32, i32, i32) {
    %c0_i32 = arith.constant 0 : i32
    %c0_i32_0 = arith.constant 0 : i32
    %c0_i32_1 = arith.constant 0 : i32
    %c0_i32_2 = arith.constant 0 : i32
    %c0_i32_3 = arith.constant 0 : i32
    return %c0_i32, %c0_i32_0, %c0_i32_1, %c0_i32_2 : i32, i32, i32, i32
  }
  func.func @transform_2(%arg0: i32) -> (i32, i32, i32) {
    %c0_i32 = arith.constant 0 : i32
    %c0_i32_0 = arith.constant 0 : i32
    %c0_i32_1 = arith.constant 0 : i32
    %c0_i32_2 = arith.constant 0 : i32
    return %c0_i32, %c0_i32_0, %c0_i32_1 : i32, i32, i32
  }
  func.func @transform_3(%arg0: i32) -> (i32, i32, i32) {
    %c0_i32 = arith.constant 0 : i32
    %c0_i32_0 = arith.constant 0 : i32
    %c0_i32_1 = arith.constant 0 : i32
    %c0_i32_2 = arith.constant 0 : i32
    return %c0_i32, %c0_i32_0, %c0_i32_1 : i32, i32, i32
  }
  func.func @transform_4(%arg0: i32) -> (i32, i32, i32) {
    %c0_i32 = arith.constant 0 : i32
    %c0_i32_0 = arith.constant 0 : i32
    %c0_i32_1 = arith.constant 0 : i32
    %c0_i32_2 = arith.constant 0 : i32
    return %c0_i32, %c0_i32_0, %c0_i32_1 : i32, i32, i32
  }
  func.func @transform_5(%arg0: i32) -> (i32, i32) {
    %c0_i32 = arith.constant 0 : i32
    %c0_i32_0 = arith.constant 0 : i32
    return %arg0, %c0_i32 : i32, i32
  }
}

</mosaic_0001>

<bundles_post_ra>
// kernel: tpu_custom_call.1
= control target key start
LH: loop header
LB: loop body
LE: loop exit
PB: predicated region body
PF: predicated region fallthrough
CT: control target
= control target key end

     0   :  { %10 = vsyncpa [#allocation3], 0  ;;  %s778_s0 = inlined_call_operand.hbm [shape: f32[16,32], index: 0, kind: input, shape index: {}]   ;;  %s779_s1 = inlined_call_operand.vmem [shape: f32[2,3,16,32], index: 1, kind: input, shape index: {}]   ;;  %s780_s2 = inlined_call_operand.hbm [shape: f32[2,1,32], index: 2, kind: input, shape index: {}]   ;;  %s781_s3 = inlined_call_operand.vmem [shape: f32[2,32,16], index: 3, kind: input, shape index: {}]   ;;  %s782_s4 = inlined_call_operand.vmem [shape: f32[2,1,16], index: 4, kind: input, shape index: {}]   ;;  %s783_s5 = inlined_call_operand.hbm [shape: f32[16,32], index: 5, kind: output, shape index: {}]  }
   0x1   :  { %11 = vsyncpa [#allocation6], 0 }
   0x2   :  { %12 = vsyncpa [#allocation4], 0  ;;  %s17_s20 = sshll.u32 %s778_s0, 4  ;;  %s629_s21 = smov [#allocation2]   ;;  %s18_s20 = int_to_ptr.hbm [resolvable:$true] %s17_s20 }
   0x3   :  { %s19_s22 = sshll.u32 %s629_s21, 4  ;;  %s32_s25 = sshll.u32 %s780_s2, 4  ;;  %s20_s22 = int_to_ptr.vmem [resolvable:$true] %s19_s22  ;;  %s33_s25 = int_to_ptr.hbm [resolvable:$true] %s32_s25 }
   0x4   :  { %s630_s26 = smov 128   ;;  %s631_s27 = smov 8  }
   0x5   :  { %25 = dma.hbm_to_vmem [thread:$0]  %s18_s20, 256, %s20_s22, [#allocation3], %s630_s26, %s630_s26, %s631_s27  }
   0x6   :  { %s632_s28 = smov [#allocation5]   ;;  %s633_s30 = smov 16  }
   0x7   :  { %s34_s29 = sshll.u32 %s632_s28, 4  ;;  %s634_s0 = smov 1   ;;  %s35_s29 = int_to_ptr.vmem [resolvable:$true] %s34_s29 }
   0x8   :  { %40 = dma.hbm_to_vmem [thread:$0]  %s33_s25, 32, %s35_s29, [#allocation6], %s633_s30, %s633_s30, %s634_s0  }
   0x9   :  { %623 = dma.done.wait [#allocation3], 256  }
   0xa   :  { %624 = vsyncadd [#allocation3], 4294967040 }
   0xb   :  { %625 = dma.done.wait [#allocation6], 32  }
   0xc   :  { %626 = vsyncadd [#allocation6], 4294967264  ;;  %v56_v0 = vld [vmem:[%s779_s1 + $0x8] sm:$0xff]  ;;  %v505_v1 = vld [vmem:[%s779_s1 + $0x18] sm:$0xff]  ;;  %vm61_vm0 = vcmask 130048   ;;  %s635_s15 = smov 112  }
   0xd   :  { %v55_v2 = vld [vmem:[%s779_s1] sm:$0xff]  ;;  %82 = vmatpush.msra.mxu0 %v56_v0  ;;  %150 = vmatpush.msra.mxu2 %v505_v1  ;;  %v504_v3 = vld [vmem:[%s779_s1 + $0x10] sm:$0xff]  ;;  %v511_v5 = vld [vmem:[%s779_s1 + $0x28] sm:$0xff]  ;;  %vm101_vm1 = vcmask 261120   ;;  %vm477_vm2 = vcmask 261248   ;;  %s486_s29 = sshll.u32 %s783_s5, 4  ;;  %s487_s29 = int_to_ptr.hbm [resolvable:$true] %s486_s29 }
   0xe   :  { %v53_v4 = vld [vmem:[#allocation2] sm:$0xff]  ;;  %v96_v6 = vld [vmem:[%s781_s3 + $0x18] sm:$0xff]  ;;  %v54_v8 = vld [vmem:[#allocation2 + $0x8] sm:$0xff] }
   0xf   :  { %271 = vrot.lane.b32.xlu0 %v53_v4, %s635_s15  ;;  %83 = vmatpush.msra.mxu0 %v55_v2  ;;  %v510_v7 = vld [vmem:[%s779_s1 + $0x20] sm:$0xff]  ;;  %v95_v9 = vld [vmem:[%s781_s3 + $0x10] sm:$0xff]  ;;  %v94_v10 = vld [vmem:[%s781_s3 + $0x8] sm:$0xff] }
  0x10   :  { %151 = vmatpush.msra.mxu2 %v504_v3  ;;  %500 = vmatmul.msk.f32.vlgmr.msra.gmra.mxu0 %vm61_vm0, %v53_v4  ;;  %v93_v11 = vld [vmem:[%s781_s3] sm:$0xff]  ;;  %v517_v12 = vld [vmem:[%s779_s1 + $0x38] sm:$0xff]  ;;  %v516_v13 = vld [vmem:[%s779_s1 + $0x30] sm:$0xff] }
  0x11   :  { %506 = vmatmul.msk.f32.vlgmr.msra.gmra.mxu2 %vm61_vm0, %v53_v4  ;;  %211 = vmatpush.msrb.mxu0 %v511_v5  ;;  %v528_v14 = vld [vmem:[%s779_s1 + $0x48] sm:$0xff]  ;;  %v527_v16 = vld [vmem:[%s779_s1 + $0x40] sm:$0xff]  ;;  %v547_v18 = vld [vmem:[#allocation5] ss:$0 sm:$0xff] }
  0x12   :  { %120 = vmatpush.msra.mxu1 %v96_v6  ;;  %179 = vmatpush.msra.mxu3 %v96_v6  ;;  %v534_v22 = vld [vmem:[%s779_s1 + $0x58] sm:$0xff]  ;;  %v533_v23 = vld [vmem:[%s779_s1 + $0x50] sm:$0xff]  ;;  %v521_v43 = vld [vmem:[%s781_s3 + $0x28] sm:$0xff] }
  0x13   :  { %240 = vmatpush.msrb.mxu2 %v96_v6  ;;  %212 = vmatpush.msrb.mxu0 %v510_v7  ;;  %v523_v39 = vld [vmem:[%s781_s3 + $0x38] sm:$0xff]  ;;  %v522_v40 = vld [vmem:[%s781_s3 + $0x30] sm:$0xff]  ;;  %v520_v46 = vld [vmem:[%s781_s3 + $0x20] sm:$0xff] }
  0x14   :  { %121 = vmatpush.msra.mxu1 %v95_v9  ;;  %180 = vmatpush.msra.mxu3 %v95_v9  ;;  %v549_v41 = vld [vmem:[#allocation5 + $0x1] ss:$0 sm:$0xff]  ;;  %v548_v53 = vld [vmem:[%s782_s4] ss:$0 sm:$0xff] }
  0x15   :  { %241 = vmatpush.msrb.mxu2 %v95_v9  ;;  %362 = vmatpush.msra.mxu0 %v528_v14 }
  0x16   :  { %122 = vmatpush.msra.mxu1 %v94_v10  ;;  %181 = vmatpush.msra.mxu3 %v94_v10 }
  0x17   :  { %273 = vrot.lane.b32.xlu0 %v54_v8, %s635_s15  ;;  %242 = vmatpush.msrb.mxu2 %v94_v10 }
  0x18   :  { %501 = vmatmul.msk.f32.gmra.mxu0 %vm61_vm0, %v54_v8  ;;  %123 = vmatpush.msra.mxu1 %v93_v11 }
  0x19   :  { %507 = vmatmul.msk.f32.gmra.mxu2 %vm61_vm0, %v54_v8  ;;  %182 = vmatpush.msra.mxu3 %v93_v11 }
  0x1a   :  { %243 = vmatpush.msrb.mxu2 %v93_v11  ;;  %293 = vmatpush.msrb.mxu1 %v517_v12 }
  0x1b   :  { %363 = vmatpush.msra.mxu0 %v527_v16  ;;  %332 = vmatpush.msrb.mxu3 %v523_v39 }
  0x1c   :  { %294 = vmatpush.msrb.mxu1 %v516_v13  ;;  %391 = vmatpush.msra.mxu2 %v523_v39 }
  0x1d   :  { %333 = vmatpush.msrb.mxu3 %v522_v40 }
  0x1e   :  { %392 = vmatpush.msra.mxu2 %v522_v40 }
  0x1f   :  { %334 = vmatpush.msrb.mxu3 %v521_v43 }
  0x20   :  { %512 = vmatmul.msk.f32.vlgmr.msrb.gmra.mxu0 %vm61_vm0, %v53_v4  ;;  %393 = vmatpush.msra.mxu2 %v521_v43 }
  0x21   :  { %335 = vmatpush.msrb.mxu3 %v520_v46 }
  0x22   :  { %394 = vmatpush.msra.mxu2 %v520_v46 }
  0x28   :  { %513 = vmatmul.msk.f32.gmra.mxu0 %vm61_vm0, %v54_v8 }
  0x81   :  { %v272_v15 = vpop.permute.xlu0 %271 }
  0x82   :  { %529 = vmatmul.msk.f32.vlgmr.msra.gmra.mxu0 %vm61_vm0, %v272_v15 }
  0x89   :  { %v274_v17 = vpop.permute.xlu0 %273 }
  0x8a   :  { %530 = vmatmul.msk.f32.gmra.mxu0 %vm61_vm0, %v274_v17 }
  0x8d   :  { %v85_v19 = vpop.f32.mrf.mxu0 }
  0x8e   :  { %v86_v20 = vadd.f32 %v547_v18, %v85_v19 }
  0x90   :  { %v91_v21 = vmax.f32 %v86_v20, 0.0 }
  0x92   :  { %502 = vmatmul.msk.f32.vlgmr.msra.gmra.mxu1 %vm101_vm1, %v91_v21 }
  0x93   :  { %423 = vmatpush.msra.mxu1 %v534_v22 }
  0x94   :  { %v153_v24 = vpop.f32.mrf.mxu2 }
  0x95   :  { %v154_v25 = vadd.f32 %v547_v18, %v153_v24  ;;  %v88_v26 = vpop.f32.mrf.mxu0  ;;  %424 = vmatpush.msra.mxu1 %v533_v23 }
  0x96   :  { %v89_v28 = vadd.f32 %v547_v18, %v88_v26 }
  0x97   :  { %v159_v27 = vmax.f32 %v154_v25, 0.0  ;;  %v550_v25 = vld [vmem:[%s782_s4 + $0x1] ss:$0 sm:$0xff]  ;;  %s636_s4 = smov [#allocation7]  }
  0x98   :  { %v92_v29 = vmax.f32 %v89_v28, 0.0  ;;  %s484_s24 = sshll.u32 %s636_s4, 4  ;;  %s485_s24 = int_to_ptr.vmem [resolvable:$true] %s484_s24 }
  0x99   :  { %508 = vmatmul.msk.f32.vlgmr.msra.gmra.mxu3 %vm101_vm1, %v159_v27 }
  0x9a   :  { %503 = vmatmul.msk.f32.gmra.mxu1 %vm101_vm1, %v92_v29  ;;  %452 = vmatpush.msra.mxu3 %v523_v39 }
  0x9c   :  { %v156_v30 = vpop.f32.mrf.mxu2  ;;  %453 = vmatpush.msra.mxu3 %v522_v40 }
  0x9d   :  { %v157_v31 = vadd.f32 %v547_v18, %v156_v30  ;;  %v214_v32 = vpop.f32.mrf.mxu0 }
  0x9e   :  { %v215_v34 = vadd.f32 %v547_v18, %v214_v32  ;;  %454 = vmatpush.msra.mxu3 %v521_v43 }
  0x9f   :  { %v160_v33 = vmax.f32 %v157_v31, 0.0 }
  0xa0   :  { %v220_v35 = vmax.f32 %v215_v34, 0.0  ;;  %455 = vmatpush.msra.mxu3 %v520_v46 }
  0xa1   :  { %509 = vmatmul.msk.f32.gmra.mxu3 %vm101_vm1, %v160_v33 }
  0xa2   :  { %514 = vmatmul.msk.f32.vlgmr.msrb.gmra.mxu2 %vm101_vm1, %v220_v35  ;;  %518 = vmatmul.msk.f32.vlgmr.msrb.gmra.mxu1 %vm61_vm0, %v272_v15 }
  0xa5   :  { %v217_v36 = vpop.f32.mrf.mxu0 }
  0xa6   :  { %v218_v37 = vadd.f32 %v547_v18, %v217_v36 }
  0xa8   :  { %v221_v38 = vmax.f32 %v218_v37, 0.0 }
  0xaa   :  { %515 = vmatmul.msk.f32.gmra.mxu2 %vm101_vm1, %v221_v38  ;;  %519 = vmatmul.msk.f32.gmra.mxu1 %vm61_vm0, %v274_v17 }
  0xb2   :  { %535 = vmatmul.msk.f32.vlgmr.msra.gmra.mxu1 %vm61_vm0, %v272_v15 }
  0xba   :  { %536 = vmatmul.msk.f32.gmra.mxu1 %vm61_vm0, %v274_v17 }
  0xff   :  { %v365_v42 = vpop.f32.mrf.mxu0 }
 0x100   :  { %v366_v44 = vadd.f32 %v549_v41, %v365_v42 }
 0x102   :  { %v371_v45 = vmax.f32 %v366_v44, 0.0 }
 0x104   :  { %531 = vmatmul.msk.f32.vlgmr.msra.gmra.mxu2 %vm101_vm1, %v371_v45 }
 0x107   :  { %v368_v47 = vpop.f32.mrf.mxu0 }
 0x108   :  { %v369_v48 = vadd.f32 %v549_v41, %v368_v47 }
 0x10a   :  { %v372_v49 = vmax.f32 %v369_v48, 0.0 }
 0x10c   :  { %532 = vmatmul.msk.f32.gmra.mxu2 %vm101_vm1, %v372_v49 }
 0x10f   :  { %v125_v50 = vpop.f32.mrf.mxu1 }
 0x110   :  { %v126_v57 = vadd.f32 %v548_v53, %v125_v50 }
 0x112   :  { %v131_v62 = vmax.f32 %v126_v57, 0.0 }
 0x117   :  { %v128_v51 = vpop.f32.mrf.mxu1 }
 0x118   :  { %v129_v5 = vadd.f32 %v548_v53, %v128_v51 }
 0x11a   :  { %v132_v11 = vmax.f32 %v129_v5, 0.0 }
 0x11c   :  { %v184_v52 = vpop.f32.mrf.mxu3 }
 0x11d   :  { %v185_v55 = vadd.f32 %v548_v53, %v184_v52 }
 0x11f   :  { %v296_v54 = vpop.f32.mrf.mxu1  ;;  %v190_v59 = vmax.f32 %v185_v55, 0.0 }
 0x120   :  { %v297_v56 = vadd.f32 %v549_v41, %v296_v54 }
 0x121   :  { %v192_v1 = vadd.f32 %v190_v59, %v131_v62 }
 0x122   :  { %v302_v58 = vmax.f32 %v297_v56, 0.0 }
 0x124   :  { %525 = vmatmul.msk.f32.vlgmr.msrb.gmra.mxu3 %vm101_vm1, %v302_v58  ;;  %v187_v60 = vpop.f32.mrf.mxu3 }
 0x125   :  { %v245_v61 = vpop.f32.mrf.mxu2  ;;  %v188_v2 = vadd.f32 %v548_v53, %v187_v60 }
 0x126   :  { %v246_v63 = vadd.f32 %v548_v53, %v245_v61 }
 0x127   :  { %v299_v0 = vpop.f32.mrf.mxu1  ;;  %v191_v8 = vmax.f32 %v188_v2, 0.0 }
 0x128   :  { %v251_v3 = vmax.f32 %v246_v63, 0.0  ;;  %v300_v4 = vadd.f32 %v549_v41, %v299_v0 }
 0x129   :  { %v193_v14 = vadd.f32 %v191_v8, %v132_v11 }
 0x12a   :  { %v253_v6 = vadd.f32 %v251_v3, %v192_v1  ;;  %v303_v7 = vmax.f32 %v300_v4, 0.0 }
 0x12c   :  { %v255_v9 = vmul.f32 0.33333334, %v253_v6  ;;  %526 = vmatmul.msk.f32.gmra.mxu3 %vm101_vm1, %v303_v7 }
 0x12d   :  { %v248_v10 = vpop.f32.mrf.mxu2 }
 0x12e   :  { %257 = vst.msk [vmem:[#allocation7] sm:$0xff] %vm61_vm0, %v255_v9  ;;  %v249_v12 = vadd.f32 %v548_v53, %v248_v10 }
 0x12f   :  { %v426_v13 = vpop.f32.mrf.mxu1 }
 0x130   :  { %v252_v15 = vmax.f32 %v249_v12, 0.0  ;;  %v427_v16 = vadd.f32 %v549_v41, %v426_v13 }
 0x132   :  { %v254_v17 = vadd.f32 %v252_v15, %v193_v14  ;;  %v432_v18 = vmax.f32 %v427_v16, 0.0 }
 0x134   :  { %v256_v19 = vmul.f32 0.33333334, %v254_v17  ;;  %537 = vmatmul.msk.f32.vlgmr.msra.gmra.mxu3 %vm101_vm1, %v432_v18 }
 0x136   :  { %258 = vst.msk [vmem:[#allocation7 + $0x8] sm:$0xff] %vm61_vm0, %v256_v19 }
 0x137   :  { %v429_v20 = vpop.f32.mrf.mxu1 }
 0x138   :  { %v430_v21 = vadd.f32 %v549_v41, %v429_v20 }
 0x13a   :  { %v433_v22 = vmax.f32 %v430_v21, 0.0 }
 0x13c   :  { %538 = vmatmul.msk.f32.gmra.mxu3 %vm101_vm1, %v433_v22 }
 0x187   :  { %v396_v24 = vpop.f32.mrf.mxu2 }
 0x188   :  { %v397_v28 = vadd.f32 %v550_v25, %v396_v24 }
 0x18a   :  { %v402_v30 = vmax.f32 %v397_v28, 0.0 }
 0x18f   :  { %v399_v31 = vpop.f32.mrf.mxu2 }
 0x190   :  { %v400_v35 = vadd.f32 %v550_v25, %v399_v31 }
 0x192   :  { %v403_v40 = vmax.f32 %v400_v35, 0.0 }
 0x1a7   :  { %v337_v23 = vpop.f32.mrf.mxu3 }
 0x1a8   :  { %v338_v27 = vadd.f32 %v550_v25, %v337_v23 }
 0x1aa   :  { %v343_v29 = vmax.f32 %v338_v27, 0.0 }
 0x1ac   :  { %v404_v37 = vadd.f32 %v402_v30, %v343_v29 }
 0x1af   :  { %v340_v26 = vpop.f32.mrf.mxu3 }
 0x1b0   :  { %v341_v34 = vadd.f32 %v550_v25, %v340_v26 }
 0x1b2   :  { %v344_v39 = vmax.f32 %v341_v34, 0.0 }
 0x1b4   :  { %v405_v44 = vadd.f32 %v403_v40, %v344_v39 }
 0x1b7   :  { %v457_v32 = vpop.f32.mrf.mxu3 }
 0x1b8   :  { %v458_v33 = vadd.f32 %v550_v25, %v457_v32 }
 0x1ba   :  { %v463_v36 = vmax.f32 %v458_v33, 0.0 }
 0x1bc   :  { %v465_v38 = vadd.f32 %v463_v36, %v404_v37 }
 0x1be   :  { %v467_v41 = vmul.f32 0.33333334, %v465_v38 }
 0x1bf   :  { %v460_v42 = vpop.f32.mrf.mxu3 }
 0x1c0   :  { %v461_v43 = vadd.f32 %v550_v25, %v460_v42  ;;  %471 = vrot.lane.b32.xlu1 %v467_v41, %s633_s30 }
 0x1c2   :  { %v464_v45 = vmax.f32 %v461_v43, 0.0 }
 0x1c4   :  { %v466_v46 = vadd.f32 %v464_v45, %v405_v44 }
 0x1c6   :  { %v468_v47 = vmul.f32 0.33333334, %v466_v46 }
 0x1c8   :  { %473 = vrot.lane.b32.xlu1 %v468_v47, %s633_s30 }
 0x232   :  { %v472_v48 = vpop.permute.xlu1 %471 }
 0x233   :  { %478 = vst.msk [vmem:[#allocation7] sm:$0xff] %vm477_vm2, %v472_v48 }
 0x23a   :  { %v474_v49 = vpop.permute.xlu1 %473 }
 0x23b   :  { %479 = vst.msk [vmem:[#allocation7 + $0x8] sm:$0xff] %vm477_vm2, %v474_v49 }
 0x23c   :  { %492 = dma.vmem_to_hbm [thread:$0]  %s485_s24, 256, %s487_s29, [#allocation4], %s630_s26, %s630_s26, %s631_s27  }
 0x23d   :  { %627 = dma.done.wait [#allocation4], 256  }
 0x23e   :  { %628 = vsyncadd [#allocation4], 4294967040 }
 0x23f   :  { %497 = vsyncpa [#allocation3], 1 }
 0x240   :  { %498 = vsyncpa [#allocation6], 1 }
 0x241   :  { %499 = vsyncpa [#allocation4], 1 }

</bundles_post_ra>
